<compile_context>
chip_gen: v7x
topology: tpu7x:2x2x1
jax: 0.10.0
libtpu: 0.0.40
codegen_flags: <defaults>
</compile_context>

<pallas_src>
import functools

import jax
import jax.numpy as jnp
from jax.experimental import pallas as pl
from jax.experimental.pallas import tpu as pltpu


LOGIT_LANES = 128  # lane-dense width of the combined a_src/a_dst logit matmul


# ---------------------------------------------------------------------------
# Kernels
# ---------------------------------------------------------------------------

def _gat_precompute_kernel(x_ref, w_ref, aw_ref, xt_ref, logits_ref):
    """Row-tiled: xt = x @ W (bf16 out) + combined per-head attention logits.

    x_ref      : (T, F_in)        input rows (f32 or bf16)
    w_ref      : (F_in, H*C) bf16 resident (pre-cast in the wrapper)
    aw_ref     : (H*C, 128)  f32  cols [0:H]=att_src blockdiag, [H:2H]=att_dst
    xt_ref     : (T, H*C)    bf16 transformed features (MXU operand later)
    logits_ref : (T, 128)    f32  [:, :H]=a_src, [:, H:2H]=a_dst
    """
    xt = jnp.dot(x_ref[...].astype(jnp.bfloat16), w_ref[...],
                 preferred_element_type=jnp.float32)
    xt_ref[...] = xt.astype(xt_ref.dtype)
    logits_ref[...] = jnp.dot(xt, aw_ref[...], preferred_element_type=jnp.float32)


def _gat_attn_kernel(xt_ref, asrc_t_ref, adst_ref, adj_ref, bias_ref, out_ref,
                     *, heads, out_dim, tile):
    """Masked-softmax attention + aggregation + bias + ELU for one dst-row tile.

    xt_ref     : (N, H*C) bf16  resident
    asrc_t_ref : (H, N)   f32   resident; row h = source logits for head h
    adst_ref   : (N, H)   f32   resident; dst logits (alpha_edge folded in)
    adj_ref    : (T, N)   bf16  adj[dst, src] in {0,1}, self-loops included
    bias_ref   : (1, H*C) f32
    out_ref    : (T, H*C) bf16 or f32
    """
    start = pl.multiple_of(pl.program_id(0) * tile, tile)
    adj = adj_ref[...].astype(jnp.float32)                    # (T, N) in {0,1}
    negmask = (adj - 1.0) * jnp.float32(1e30)                 # 0 on edges, -1e30 off
    xt = xt_ref[...]                                          # (N, H*C) bf16
    adst = adst_ref[pl.ds(start, tile), :]                    # (T, H)
    bias = bias_ref[...]                                      # (1, H*C)

    for h in range(heads):
        lo = h * out_dim
        hi = lo + out_dim
        # e[t, n] = LeakyReLU(a_dst[t] + a_src[n]) restricted to edges.
        z = adst[:, h:h + 1] + asrc_t_ref[h:h + 1, :]         # (T, N)
        e = jnp.maximum(z, 0.2 * z) + negmask                 # LeakyReLU(0.2) + mask
        m = jnp.max(e, axis=-1, keepdims=True)
        p = jnp.exp(e - m)                                    # unnormalized probs
        s = jnp.sum(p, axis=-1, keepdims=True)                # >= 1 (self-loop)
        oh = jnp.dot(p.astype(jnp.bfloat16), xt[:, lo:hi],
                     preferred_element_type=jnp.float32)      # (T, C)
        oh = oh * pl.reciprocal(s, approx=True) + bias[:, lo:hi]
        # ELU (applied right after each conv in the PyTorch model)
        oh = jnp.where(oh > 0, oh, jnp.exp(jnp.minimum(oh, 0.0)) - 1.0)
        out_ref[:, lo:hi] = oh.astype(out_ref.dtype)          # lane-dense per-head store


# ---------------------------------------------------------------------------
# Wrappers
# ---------------------------------------------------------------------------

def _round_up(x, m):
    return ((x + m - 1) // m) * m


def _vmem_budget_bytes():
    try:
        cap = int(pltpu.get_tpu_info().vmem_capacity_bytes)
    except Exception:
        cap = 64 * 1024 * 1024          # conservative (v7x per-TC VMEM)
    return max(16 * 1024 * 1024, cap // 2)


def _pick_tile(n, heads, out_dim, budget):
    """Largest dst-row tile (and its n_pad) whose attention working set fits the
    VMEM budget, keeping >= 4 grid steps (megacore split + DMA overlap)."""
    hc = heads * out_dim
    n_min = _round_up(max(n, 8), 8)
    for cand in (512, 256, 128, 64, 32, 16, 8):
        n_pad = _round_up(n_min, cand)          # evaluate with THIS tile's padding
        if cand > 8 and n_pad // cand < 4:
            continue                            # too few grid steps
        lanes_n = _round_up(n_pad, 128)
        # Pallas double-buffers every BlockSpec input, incl. constant-index blocks.
        resident = 2 * (n_pad * hc * 2          # xt        bf16
                        + 8 * lanes_n * 4       # a_src^T   (H<=8 sublanes)
                        + n_pad * 128 * 4       # a_dst     (lane-padded to 128)
                        + 8 * hc * 4)           # bias
        streamed = 2 * (cand * lanes_n * 2      # adj tile  bf16
                        + cand * hc * 4)        # out tile  (<= f32)
        temps = (3 + heads) * cand * lanes_n * 4   # negmask + per-head e/p f32
        if resident + streamed + temps <= budget:
            return cand, n_pad
    return 8, _round_up(n_min, 8)


def gat_layer(x, layer_params, adj, *, heads, out_dim, tile, vmem_limit, out_dtype):
    """One dense GATConv layer (PyG semantics, edge_attr == 1) + ELU."""
    w, att_src, att_dst, att_edge, lin_edge_w, bias = layer_params
    n_pad = adj.shape[0]
    hc = heads * out_dim
    f_in = x.shape[1]
    grid = (n_pad // tile,)
    cparams = pltpu.CompilerParams(dimension_semantics=("parallel",),
                                   vmem_limit_bytes=vmem_limit)

    # Block-diagonal stacks of the per-head attention vectors, concatenated into
    # one lane-dense (H*C, 128) operand: a single MXU matmul produces both logit
    # sets with an unmasked 128-lane store.
    eye_h = jnp.eye(heads, dtype=jnp.float32)
    asrc_w = (att_src[:, :, None] * eye_h[:, None, :]).reshape(hc, heads)
    adst_w = (att_dst[:, :, None] * eye_h[:, None, :]).reshape(hc, heads)
    a_w = jnp.zeros((hc, LOGIT_LANES), jnp.float32)
    a_w = a_w.at[:, :heads].set(asrc_w).at[:, heads:2 * heads].set(adst_w)

    # edge_attr is identically 1 (incl. self-loop 'mean' fill): the edge term is
    # a per-head constant; fold into a_dst (softmax-invariant, kept for fidelity).
    edge_feat = lin_edge_w.reshape(heads, out_dim)
    alpha_edge = jnp.sum(edge_feat * att_edge, axis=-1).reshape(1, heads)

    xt, logits = pl.pallas_call(
        _gat_precompute_kernel,
        out_shape=(
            jax.ShapeDtypeStruct((n_pad, hc), jnp.bfloat16),
            jax.ShapeDtypeStruct((n_pad, LOGIT_LANES), jnp.float32),
        ),
        grid=grid,
        in_specs=[
            pl.BlockSpec((tile, f_in), lambda i: (i, 0)),          # x row tile
            pl.BlockSpec((f_in, hc), lambda i: (0, 0)),            # W (resident, bf16)
            pl.BlockSpec((hc, LOGIT_LANES), lambda i: (0, 0)),     # att operand
        ],
        out_specs=(
            pl.BlockSpec((tile, hc), lambda i: (i, 0)),
            pl.BlockSpec((tile, LOGIT_LANES), lambda i: (i, 0)),
        ),
        compiler_params=cparams,
    )(x, w.astype(jnp.bfloat16), a_w)

    asrc_t = logits[:, :heads].T                       # (H, N) resident rows
    adst = logits[:, heads:2 * heads] + alpha_edge     # (N, H), row-sliced in-kernel
    bias2d = bias.reshape(1, hc).astype(jnp.float32)

    kernel = functools.partial(_gat_attn_kernel, heads=heads, out_dim=out_dim,
                               tile=tile)
    return pl.pallas_call(
        kernel,
        out_shape=jax.ShapeDtypeStruct((n_pad, hc), out_dtype),
        grid=grid,
        in_specs=[
            pl.BlockSpec((n_pad, hc), lambda i: (0, 0)),       # xt (resident)
            pl.BlockSpec((heads, n_pad), lambda i: (0, 0)),    # a_src rows (resident)
            pl.BlockSpec((n_pad, heads), lambda i: (0, 0)),    # a_dst (resident)
            pl.BlockSpec((tile, n_pad), lambda i: (i, 0)),     # adj row tile (bf16)
            pl.BlockSpec((1, hc), lambda i: (0, 0)),           # bias
        ],
        out_specs=pl.BlockSpec((tile, hc), lambda i: (i, 0)),
        compiler_params=cparams,                               # v7x: 2 TCs split rows
    )(xt, asrc_t, adst, adj, bias2d)


def condition_predictor_gat(x, edge_index, batch, encounter_indices, params, hidden):
    n = x.shape[0]
    budget = _vmem_budget_bytes()
    # Tile sized against the bigger (heads=3) layer's working set; same tile /
    # padding / adjacency shared by both layers.
    tile, n_pad = _pick_tile(n, heads=3, out_dim=hidden, budget=budget)

    # Dense adjacency adj[dst, src] = 1 plus self-loops, stored bf16 (0/1 exact):
    # half the HBM traffic / VMEM of the only O(N^2) operand.
    src, dst = edge_index[0], edge_index[1]
    adj = jnp.zeros((n_pad, n_pad), jnp.bfloat16).at[dst, src].set(1.0)
    adj = jnp.maximum(adj, jnp.eye(n_pad, dtype=jnp.bfloat16))

    x_pad = jnp.zeros((n_pad, x.shape[1]), jnp.float32).at[:n].set(x)

    # conv1 output in bf16 (conv2 consumes bf16 anyway; 384 lanes stays dense).
    h = gat_layer(x_pad, params["conv1"], adj, heads=3, out_dim=hidden,
                  tile=tile, vmem_limit=budget, out_dtype=jnp.bfloat16)
    h = gat_layer(h, params["conv2"], adj, heads=1, out_dim=hidden,
                  tile=tile, vmem_limit=budget, out_dtype=jnp.float32)

    # Gather one "encounter" node per graph (local index within the graph's node
    # block; nodes sorted by batch id). Padded rows are never selected.
    num_graphs = encounter_indices.shape[0]
    offsets = jnp.searchsorted(batch, jnp.arange(num_graphs, dtype=batch.dtype))
    emb = h[offsets + encounter_indices]                          # [num_graphs, hidden]

    # Tiny classifier head in plain JAX (a pallas_call here is pure overhead).
    w1, b1, w2, b2 = params["classifier"]
    z = jnp.maximum(emb @ w1 + b1, 0.0)
    return jax.nn.sigmoid(z @ w2 + b2)


def init_params(key, num_node_features, num_conditions, hidden):
    ks = jax.random.split(key, 16)

    def nrm(k, shape, scale=0.2):
        return scale * jax.random.normal(k, shape, jnp.float32)

    conv1 = (
        nrm(ks[0], (num_node_features, 3 * hidden)),  # lin weight (shared src/dst)
        nrm(ks[1], (3, hidden)),                      # att_src
        nrm(ks[2], (3, hidden)),                      # att_dst
        nrm(ks[3], (3, hidden)),                      # att_edge
        nrm(ks[4], (3 * hidden,)),                    # lin_edge weight (edge_dim=1)
        nrm(ks[5], (3 * hidden,)),                    # bias (concat -> heads*out)
    )
    conv2 = (
        nrm(ks[6], (3 * hidden, hidden)),
        nrm(ks[7], (1, hidden)),
        nrm(ks[8], (1, hidden)),
        nrm(ks[9], (1, hidden)),
        nrm(ks[10], (hidden,)),
        nrm(ks[11], (hidden,)),
    )
    clf = (
        nrm(ks[12], (hidden, hidden)),
        nrm(ks[13], (hidden,)),
        nrm(ks[14], (hidden, num_conditions)),
        nrm(ks[15], (num_conditions,)),
    )
    return {"conv1": conv1, "conv2": conv2, "classifier": clf}


if __name__ == "__main__":
    key = jax.random.PRNGKey(0)
    kx, kp = jax.random.split(key)

    num_node_features = 4
    num_conditions = 5
    hidden = 128                       # PyTorch default; lane-dense (128 / 384)
    nodes_per_graph, num_graphs = 8, 2
    N = nodes_per_graph * num_graphs

    x = jax.random.normal(kx, (N, num_node_features), jnp.float32)

    # two bidirectional ring graphs
    edges = []
    for g in range(num_graphs):
        base = g * nodes_per_graph
        for u in range(nodes_per_graph):
            v = (u + 1) % nodes_per_graph
            edges.append((base + u, base + v))
            edges.append((base + v, base + u))
    edge_index = jnp.array(edges, dtype=jnp.int32).T                 # [2, E]
    batch = jnp.repeat(jnp.arange(num_graphs, dtype=jnp.int32), nodes_per_graph)
    encounter_indices = jnp.array([2, 5], dtype=jnp.int32)           # local node idx per graph

    params = init_params(kp, num_node_features, num_conditions, hidden)

    out = condition_predictor_gat(x, edge_index, batch, encounter_indices, params, hidden)
    out = jax.block_until_ready(out)

    assert out.shape == (num_graphs, num_conditions), out.shape
    assert bool(jnp.all(jnp.isfinite(out)))
    assert bool(jnp.all((out >= 0.0) & (out <= 1.0)))
    print("KERNEL_OK")
</pallas_src>

<mosaic_0001>
module attributes {stable_mosaic.version = 11 : i64} {
  func.func @_gat_precompute_kernel(%arg0: i32, %arg1: memref<8x4xf32, #tpu.memory_space<vmem>>, %arg2: memref<4x384xbf16, #tpu.memory_space<vmem>>, %arg3: memref<384x128xf32, #tpu.memory_space<vmem>>, %arg4: memref<8x384xbf16, #tpu.memory_space<vmem>>, %arg5: memref<8x128xf32, #tpu.memory_space<vmem>>) attributes {dimension_semantics = [#tpu.dimension_semantics<parallel>], iteration_bounds = array<i64: 2>, scalar_prefetch = 0 : i64, scratch_operands = 0 : i64, tpu.core_type = #tpu.core_type<tc>, window_params = [{transform_indices = @transform_0, window_bounds = array<i64: 8, 4>}, {pipeline_mode = #tpu.pipeline_mode<synchronous>, transform_indices = @transform_1, window_bounds = array<i64: 4, 384>}, {pipeline_mode = #tpu.pipeline_mode<synchronous>, transform_indices = @transform_2, window_bounds = array<i64: 384, 128>}, {transform_indices = @transform_3, window_bounds = array<i64: 8, 384>}, {transform_indices = @transform_4, window_bounds = array<i64: 8, 128>}]} {
    %c0 = arith.constant 0 : index
    %c0_0 = arith.constant 0 : index
    %0 = vector.load %arg1[%c0, %c0_0] : memref<8x4xf32, #tpu.memory_space<vmem>>, vector<8x4xf32>
    %1 = arith.truncf %0 : vector<8x4xf32> to vector<8x4xbf16>
    %c0_1 = arith.constant 0 : index
    %c0_2 = arith.constant 0 : index
    %2 = vector.load %arg2[%c0_1, %c0_2] : memref<4x384xbf16, #tpu.memory_space<vmem>>, vector<4x384xbf16>
    %cst = arith.constant dense<0.000000e+00> : vector<8x384xf32>
    %3 = tpu.matmul %1, %2, %cst {dimension_numbers = #tpu.dot_dimension_numbers<[1], [0], [0], [1], [0, 0, 1, 1], [], []>} : vector<8x4xbf16>, vector<4x384xbf16>, vector<8x384xf32> -> vector<8x384xf32>
    %4 = arith.truncf %3 : vector<8x384xf32> to vector<8x384xbf16>
    %c0_3 = arith.constant 0 : index
    %c0_4 = arith.constant 0 : index
    %5 = vector.load %arg4[%c0_3, %c0_4] : memref<8x384xbf16, #tpu.memory_space<vmem>>, vector<8x384xbf16>
    tpu.vector_store %arg4[%c0_3, %c0_4], %4 {strides = array<i32>} : memref<8x384xbf16, #tpu.memory_space<vmem>>, vector<8x384xbf16>,
    %c0_5 = arith.constant 0 : index
    %c0_6 = arith.constant 0 : index
    %6 = vector.load %arg3[%c0_5, %c0_6] : memref<384x128xf32, #tpu.memory_space<vmem>>, vector<384x128xf32>
    %cst_7 = arith.constant dense<0.000000e+00> : vector<8x128xf32>
    %7 = tpu.matmul %3, %6, %cst_7 {dimension_numbers = #tpu.dot_dimension_numbers<[1], [0], [0], [1], [0, 0, 1, 1], [], []>} : vector<8x384xf32>, vector<384x128xf32>, vector<8x128xf32> -> vector<8x128xf32>
    %c0_8 = arith.constant 0 : index
    %c0_9 = arith.constant 0 : index
    %8 = vector.load %arg5[%c0_8, %c0_9] : memref<8x128xf32, #tpu.memory_space<vmem>>, vector<8x128xf32>
    tpu.vector_store %arg5[%c0_8, %c0_9], %7 {strides = array<i32>} : memref<8x128xf32, #tpu.memory_space<vmem>>, vector<8x128xf32>,
    return
  }
  func.func @transform_0(%arg0: i32) -> (i32, i32) {
    %c0_i32 = arith.constant 0 : i32
    %c0_i32_0 = arith.constant 0 : i32
    return %arg0, %c0_i32 : i32, i32
  }
  func.func @transform_1(%arg0: i32) -> (i32, i32) {
    %c0_i32 = arith.constant 0 : i32
    %c0_i32_0 = arith.constant 0 : i32
    %c0_i32_1 = arith.constant 0 : i32
    return %c0_i32, %c0_i32_0 : i32, i32
  }
  func.func @transform_2(%arg0: i32) -> (i32, i32) {
    %c0_i32 = arith.constant 0 : i32
    %c0_i32_0 = arith.constant 0 : i32
    %c0_i32_1 = arith.constant 0 : i32
    return %c0_i32, %c0_i32_0 : i32, i32
  }
  func.func @transform_3(%arg0: i32) -> (i32, i32) {
    %c0_i32 = arith.constant 0 : i32
    %c0_i32_0 = arith.constant 0 : i32
    return %arg0, %c0_i32 : i32, i32
  }
  func.func @transform_4(%arg0: i32) -> (i32, i32) {
    %c0_i32 = arith.constant 0 : i32
    %c0_i32_0 = arith.constant 0 : i32
    return %arg0, %c0_i32 : i32, i32
  }
}

</mosaic_0001>

<bundles_post_ra>
// kernel: tpu_custom_call.1
= control target key start
LH: loop header
LB: loop body
LE: loop exit
PB: predicated region body
PF: predicated region fallthrough
CT: control target
= control target key end

     0   :  { %10 = vsyncpa [#allocation3], 0  ;;  %s1257_s0 = inlined_call_operand.vmem [shape: f32[16,4], index: 0, kind: input, shape index: {}]   ;;  %s1258_s1 = inlined_call_operand.vmem [shape: bf16[4,384], index: 1, kind: input, shape index: {}]   ;;  %s1259_s2 = inlined_call_operand.hbm [shape: f32[384,128], index: 2, kind: input, shape index: {}]   ;;  %s1260_s3 = inlined_call_operand.hbm [shape: bf16[16,384], index: 3, kind: output, shape index: {0}]   ;;  %s1261_s4 = inlined_call_operand.hbm [shape: f32[16,128], index: 4, kind: output, shape index: {1}]  }
   0x1   :  { %11 = vsyncpa [#allocation4], 0 }
   0x2   :  { %13 = vsyncpa [#allocation4 + $0x1], 0 }
   0x3   :  { %14 = vsyncpa [#allocation7], 0 }
   0x4   :  { %16 = vsyncpa [#allocation7 + $0x1], 0  ;;  %s1074_s15 = smov 0   ;;  %s1076_s16 = smov 0  }
   0x5   :  { %s1078_s17 = smov 0   ;;  %s1080_s18 = smov 0  }
   0x6 LB: > { %s1095_s19 = sadd.s32 4294967295, %s1037_s18   ;;  %s675_s20 = sadd.s32 4294967294, %s1037_s18   ;;  %s1037_s18 = sphi %s1080_s18, %s1277_s18   ;;  %s1033_s17 = sphi %s1078_s17, %s1276_s17   ;;  %s1029_s16 = sphi %s1076_s16, %s1275_s16   ;;  %s1025_s15 = sphi %s1074_s15, %s1274_s15  }
   0x7   : > { %s1099_s21 = sadd.s32 1, %s1037_s18   ;;  %s97_s22 = sadd.s32 1, %s1033_s17 }
   0x8   : > { %s94_s23 = ssub.s32 %s1037_s18, %s1099_s21  ;;  %p107_p0 = scmp.ne.s32.totalorder %s1033_s17, %s1029_s16 }
   0x9   : > { %p95_p1 = scmp.eq.s32.totalorder %s94_s23, 0  ;;  %p108_p2 = scmp.eq.s32.totalorder %s1095_s19, 1 }
   0xa   : > { %p113_p3 = scmp.ne.s32.totalorder %s1029_s16, %s1025_s15  ;;  %p114_p4 = scmp.eq.s32.totalorder %s675_s20, 1 }
   0xb   : > { %s1110_s24 = scalar_select %p95_p1, %s1033_s17, %s97_s22  }
   0xc   : > { %p1112_p5 = por %p108_p2, %p107_p0  ;;  %p1116_p6 = por %p114_p4, %p113_p3 }
   0xd   : > { %p676_p7 = scmp.ge.s32.totalorder %s1037_s18, 1  ;;  %p147_p8 = scmp.lt.s32.totalorder %s1037_s18, 3 }
   0xe   : > { %s1265_s25 = scalar_select %p1112_p5, 1, 0 }
   0xf   : > { %s1266_s26 = scalar_select %p1116_p6, 1, 0 }
  0x10   : > { %p1262_p9 = scmp.eq.s32.totalorder %s1095_s19, 0  ;;  %p1123_p10 = pnand %p676_p7, %p147_p8 }
  0x11   : > { %s1039_s28 = smov [#allocation2]   ;;  %s911_s7 = scalar_lea.hbm %s1259_s2, 6144 }
  0x12   : > { %s1267_s27 = scalar_select %p1123_p10, 1, 0 }
  0x13   : > { %s162_s29 = sshll.u32 %s1039_s28, 4  ;;  %p856_p11 = pneg %p1123_p10  ;;  %s163_s29 = int_to_ptr.vmem [resolvable:$true] %s162_s29 }
  0x14   : > { %p912_p13 = scmp.ne.s32.totalorder %s1259_s2, %s911_s7  ;;  %p918_p3 = scmp.lt.u32.totalorder %s911_s7, %s1259_s2 }
  0x15   : > { %p1131_p12 = pnand %p1262_p9, %p856_p11 }
  0x17   : > { %p913_p0 = pneg %p1131_p12 }
  0x19   : > { %p914_p1 = pnand %p913_p0, %p912_p13 }
  0x1b   : > { %p915_p2 = pneg %p914_p1 }
  0x1d   : > { %p920_p4 = pnand %p918_p3, %p915_p2 }
  0x1f   : > { %923 = shalt.err (!%p920_p4)
}
  0x20   : > { %s924_s12 = scalar_lea.vmem %s163_s29, 6144  ;;  %p932_p9 = scmp.lt.s32.totalorder %s163_s29, %s163_s29 }
  0x21   : > { %p925_p7 = scmp.ne.s32.totalorder %s163_s29, %s924_s12  ;;  %p933_p6 = scmp.lt.s32.totalorder %s924_s12, %s924_s12 }
  0x23   : > { %p927_p8 = pnand %p925_p7, %p913_p0  ;;  %p934_p5 = por %p933_p6, %p932_p9 }
  0x25   : > { %p928_p11 = pneg %p927_p8 }
  0x27   : > { %p935_p10 = pnand %p934_p5, %p928_p11 }
  0x29   : > { %938 = shalt.err (!%p935_p10)
}
  0x2a   : > { %s1040_s13 = smov 128   ;;  %s1041_s14 = smov 8  }
  0x2b   : > { %859 = dma.hbm_to_vmem [thread:$0]  (!%p1131_p12), %s1259_s2, 6144, %s163_s29, [#allocation3], %s1040_s13, %s1040_s13, %s1041_s14  }
  0x2c   : > { %p1269_p13 = scmp.ne.s32.totalorder %s1267_s27, 0 }
  0x2d   : > { %p1270_p1 = scmp.eq.s32.totalorder (!%p1269_p13), %s1095_s19, 0 }
  0x2e   : > { %185 = sbr.rel (%p1269_p13) target bundleno = 514 (0x202), region = 32 }
  0x35   : > { %1012 = dma.done.wait (%p1270_p1), [#allocation3], 6144   ;;  %p1271_p0 = pmov %p1270_p1 }
  0x36   : > { %v228_v0 = vlaneseq  ;;  %v1042_v1 = vmov 1983009808   ;;  %v1043_v3 = vmov 0.0   ;;  %p215_p5 = scmp.lt.s32.totalorder %s1095_s19, 1  ;;  %v1044_v5 = vmov 0   ;;  %v366_v9 = vld [vmem:[#allocation2 + $0x80] sm:$0xff] }
  0x37   : > { %1014 = vsyncadd (%p1271_p0), [#allocation3], 4294961152  ;;  %v226_v2 = vunpack.c.l.s4 %v1042_v1  ;;  %749 = vmatprep.subr.bf16.mxu1 %v1043_v3  ;;  %286 = vmatprep.mubr.bf16.mxu0 %v1044_v5  ;;  %vm1045_vm0 = vmmov 0   ;;  %v222_v8 = vld [vmem:[%s1258_s1] sm:$0x3f]  ;;  %vm244_vm1 = vcmask 1041408  }
  0x38   : > { %v229_v4 = vshrl.u32 %v228_v0, 7  ;;  %751 = vmatprep.mubr.msk.bf16.mxu1 %vm1045_vm0, %v1043_v3  ;;  %s216_s23 = scalar_select %p215_p5, %s1095_s19, 1  ;;  %v224_v11 = vcombine.high %v222_v8, %v222_v8  ;;  %v367_v12 = vld [vmem:[#allocation2 + $0x88] sm:$0xff]  ;;  %v350_v14 = vld [vmem:[#allocation2] sm:$0xff]  ;;  %v368_v22 = vld [vmem:[#allocation2 + $0x90] sm:$0xff]  ;;  %vm240_vm2 = vcmask 31744  }
  0x39   : > { %v227_v6 = vunpack.c.0.s8 %v226_v2  ;;  %v790_v18 = vpack.c.bf16 %v367_v12, %v366_v9  ;;  %v351_v19 = vld [vmem:[#allocation2 + $0x8] sm:$0xff]  ;;  %v382_v20 = vld [vmem:[#allocation2 + $0x100] sm:$0xff]  ;;  %v369_v23 = vld [vmem:[#allocation2 + $0x98] sm:$0xff]  ;;  %v1046_v29 = vmov 0.0|0.0   ;;  %s1182_s7 = sand.u32 1, %s1029_s16   ;;  %s847_s10 = smul.u32 192, %s1095_s19 }
  0x3a   : > { %s682_s27 = sshll.u32 %s216_s23, 3  ;;  %v383_v21 = vld [vmem:[#allocation2 + $0x108] sm:$0xff]  ;;  %v792_v26 = vpack.c.bf16 %v351_v19, %v350_v14  ;;  %v352_v28 = vld [vmem:[#allocation2 + $0x10] sm:$0xff]  ;;  %v794_v30 = vpack.c.bf16 %v369_v23, %v368_v22  ;;  %v353_v31 = vld [vmem:[#allocation2 + $0x18] sm:$0xff]  ;;  %s846_s8 = smul.u32 12, %s1182_s7 }
  0x3b   : > { %v230_v7 = vsub.s32 %v227_v6, %v229_v4  ;;  %s218_s30 = scalar_lea.vmem %s1257_s0, %s682_s27  ;;  %v823_v27 = vpack.c.bf16 %v383_v21, %v382_v20  ;;  %v384_v32 = vld [vmem:[#allocation2 + $0x110] sm:$0xff]  ;;  %v385_v33 = vld [vmem:[#allocation2 + $0x118] sm:$0xff]  ;;  %v370_v34 = vld [vmem:[#allocation2 + $0xa0] sm:$0xff]  ;;  %v796_v36 = vpack.c.bf16 %v353_v31, %v352_v28  ;;  %s1189_s14 = scalar_lea.hbm %s1260_s3, %s847_s10 }
  0x3c   : > { %v220_v13 = vld [vmem:[%s218_s30] sm:$0xff]  ;;  %v826_v37 = vpack.c.bf16 %v385_v33, %v384_v32  ;;  %v354_v38 = vld [vmem:[#allocation2 + $0x20] sm:$0xff]  ;;  %v372_v43 = vld [vmem:[#allocation2 + $0xb0] sm:$0xff]  ;;  %s207_s9 = scalar_lea.vmem [#allocation5], %s846_s8  ;;  %s540_s20 = scalar_lea.sflag [#allocation4], %s1182_s7 }
  0x3d   : > { %v231_v10 = vrot.slane %v222_v8, %v230_v7  ;;  %v238_v17 = vrot.slane %v224_v11, %v230_v7  ;;  %v221_v25 = vpack.c.bf16 %v220_v13, %v220_v13  ;;  %v371_v35 = vld [vmem:[#allocation2 + $0xa8] sm:$0xff]  ;;  %v386_v41 = vld [vmem:[#allocation2 + $0x120] sm:$0xff]  ;;  %v373_v44 = vld [vmem:[#allocation2 + $0xb8] sm:$0xff]  ;;  %s559_s11 = sshll.u32 %s207_s9, 4  ;;  %p1272_p9 = scmp.ne.s32.totalorder %s1265_s25, 0  ;;  %s560_s11 = int_to_ptr.vmem [resolvable:$true] %s559_s11 }
  0x3e   : > { %v798_v39 = vpack.c.bf16 %v371_v35, %v370_v34  ;;  %v355_v40 = vld [vmem:[#allocation2 + $0x28] sm:$0xff]  ;;  %v356_v47 = vld [vmem:[#allocation2 + $0x30] sm:$0xff]  ;;  %v802_v48 = vpack.c.bf16 %v373_v44, %v372_v43  ;;  %v357_v49 = vld [vmem:[#allocation2 + $0x38] sm:$0xff]  ;;  %s939_s22 = scalar_lea.vmem %s560_s11, 192  ;;  %s1047_s23 = smov [#allocation5]  }
  0x3f   : > { %v239_v15 = vcombine.high %v231_v10, %v231_v10  ;;  %v246_v16 = vsel %vm244_vm1, %v231_v10, 0  ;;  %v252_v24 = vsel %vm244_vm1, %v238_v17, 0  ;;  %v387_v42 = vld [vmem:[#allocation2 + $0x128] sm:$0xff]  ;;  %v800_v45 = vpack.c.bf16 %v355_v40, %v354_v38  ;;  %v388_v50 = vld [vmem:[#allocation2 + $0x130] sm:$0xff]  ;;  %v389_v51 = vld [vmem:[#allocation2 + $0x138] sm:$0xff]  ;;  %p940_p6 = scmp.ne.s32.totalorder %s560_s11, %s939_s22  ;;  %s943_s27 = sshll.u32 %s1047_s23, 4  ;;  %s944_s27 = int_to_ptr.vmem [resolvable:$false] %s943_s27 }
  0x40   : > { %750 = vmatpush3.bf16.msra.mxu1 %v252_v24  ;;  %v829_v46 = vpack.c.bf16 %v387_v42, %v386_v41  ;;  %v374_v52 = vld [vmem:[#allocation2 + $0xc0] sm:$0xff]  ;;  %v375_v53 = vld [vmem:[#allocation2 + $0xc8] sm:$0xff]  ;;  %v804_v54 = vpack.c.bf16 %v357_v49, %v356_v47  ;;  %v832_v55 = vpack.c.bf16 %v389_v51, %v388_v50  ;;  %v376_v61 = vld [vmem:[#allocation2 + $0xd0] sm:$0xff]  ;;  %s945_s28 = scalar_lea.vmem %s944_s27, 384  ;;  %p946_p2 = scmp.lt.s32.totalorder %s560_s11, %s944_s27 }
  0x41   : > { %683 = vmatprep.subr.msk.bf16.mxu0 %vm244_vm1, %v239_v15  ;;  %822 = vmatprep.subr.bf16.mxu1 %v1046_v29  ;;  %v358_v56 = vld [vmem:[#allocation2 + $0x40] sm:$0xff]  ;;  %v806_v57 = vpack.c.bf16 %v375_v53, %v374_v52  ;;  %v359_v58 = vld [vmem:[#allocation2 + $0x48] sm:$0xff]  ;;  %v377_v62 = vld [vmem:[#allocation2 + $0xd8] sm:$0xff]  ;;  %p941_p10 = pnand %p940_p6, %p1272_p9  ;;  %p947_p3 = scmp.lt.s32.totalorder %s945_s28, %s939_s22 }
  0x42   : > { %255 = vmatpush1.bf16.msra.mxu0 %v246_v16  ;;  %v390_v59 = vld [vmem:[#allocation2 + $0x140] sm:$0xff]  ;;  %v391_v60 = vld [vmem:[#allocation2 + $0x148] sm:$0xff]  ;;  %v808_v63 = vpack.c.bf16 %v359_v58, %v358_v56  ;;  %v360_v1 = vld [vmem:[#allocation2 + $0x50] sm:$0xff]  ;;  %v810_v2 = vpack.c.bf16 %v377_v62, %v376_v61 }
  0x43   : > { %791 = vmatprep.subr.bf16.mxu0 %v790_v18  ;;  %752 = vmatmul.mubr.msk.bf16.vlgmr.msra.gmra.mrb[0].mxu1 %vm240_vm2, %v221_v25  ;;  %v835_v0 = vpack.c.bf16 %v391_v60, %v390_v59  ;;  %v392_v4 = vld [vmem:[#allocation2 + $0x150] sm:$0xff]  ;;  %v393_v5 = vld [vmem:[#allocation2 + $0x158] sm:$0xff]  ;;  %v378_v6 = vld [vmem:[#allocation2 + $0xe0] sm:$0xff]  ;;  %p942_p12 = pneg %p941_p10  ;;  %p948_p4 = por %p947_p3, %p946_p2 }
  0x44   : > { %824 = vmatpush3.bf16.msra.mxu1 %v823_v27  ;;  %787 = vmatprep.mubr.msk.f32.mxu1 %vm1045_vm0, %v1043_v3  ;;  %v361_v3 = vld [vmem:[#allocation2 + $0x58] sm:$0xff]  ;;  %v379_v7 = vld [vmem:[#allocation2 + $0xe8] sm:$0xff]  ;;  %v838_v9 = vpack.c.bf16 %v393_v5, %v392_v4  ;;  %v362_v10 = vld [vmem:[#allocation2 + $0x60] sm:$0xff] }
  0x45   : > { %684 = vmatmul.mubr.msk.bf16.vlgmr.msra.gmra.mrb[0].mxu0 %vm240_vm2, %v221_v25  ;;  %825 = vmatprep.subr.bf16.mxu1 %v1046_v29  ;;  %v812_v8 = vpack.c.bf16 %v361_v3, %v360_v1  ;;  %v814_v11 = vpack.c.bf16 %v379_v7, %v378_v6  ;;  %v363_v12 = vld [vmem:[#allocation2 + $0x68] sm:$0xff]  ;;  %v394_v13 = vld [vmem:[#allocation2 + $0x160] sm:$0xff]  ;;  %v380_v15 = vld [vmem:[#allocation2 + $0xf0] sm:$0xff]  ;;  %p949_p7 = pnand %p948_p4, %p942_p12 }
  0x46   : > { %793 = vmatpush3.bf16.msra.mxu0 %v792_v26  ;;  %v395_v14 = vld [vmem:[#allocation2 + $0x168] sm:$0xff]  ;;  %v381_v16 = vld [vmem:[#allocation2 + $0xf8] sm:$0xff]  ;;  %v816_v17 = vpack.c.bf16 %v363_v12, %v362_v10  ;;  %v364_v20 = vld [vmem:[#allocation2 + $0x70] sm:$0xff] }
  0x47   : > { %795 = vmatprep.subr.bf16.mxu0 %v794_v30  ;;  %v841_v18 = vpack.c.bf16 %v395_v14, %v394_v13  ;;  %v818_v19 = vpack.c.bf16 %v381_v16, %v380_v15  ;;  %v365_v21 = vld [vmem:[#allocation2 + $0x78] sm:$0xff]  ;;  %v396_v23 = vld [vmem:[#allocation2 + $0x170] sm:$0xff] }
  0x48   : > { %827 = vmatpush3.bf16.msra.mxu1 %v826_v37  ;;  %v820_v22 = vpack.c.bf16 %v365_v21, %v364_v20  ;;  %v397_v24 = vld [vmem:[#allocation2 + $0x178] sm:$0xff] }
  0x49   : > { %828 = vmatprep.subr.bf16.mxu1 %v1046_v29  ;;  %v844_v25 = vpack.c.bf16 %v397_v24, %v396_v23 }
  0x4a   : > { %797 = vmatpush3.bf16.msra.mxu0 %v796_v36 }
  0x4b   : > { %799 = vmatprep.subr.bf16.mxu0 %v798_v39 }
  0x4c   : > { %830 = vmatpush3.bf16.msra.mxu1 %v829_v46 }
  0x4d   : > { %831 = vmatprep.subr.bf16.mxu1 %v1046_v29 }
  0x4e   : > { %801 = vmatpush3.bf16.msra.mxu0 %v800_v45 }
  0x4f   : > { %803 = vmatprep.subr.bf16.mxu0 %v802_v48 }
  0x50   : > { %833 = vmatpush3.bf16.msra.mxu1 %v832_v55 }
  0x51   : > { %834 = vmatprep.subr.bf16.mxu1 %v1046_v29 }
  0x52   : > { %805 = vmatpush3.bf16.msra.mxu0 %v804_v54 }
  0x53   : > { %807 = vmatprep.subr.bf16.mxu0 %v806_v57 }
  0x54   : > { %836 = vmatpush3.bf16.msra.mxu1 %v835_v0 }
  0x55   : > { %837 = vmatprep.subr.bf16.mxu1 %v1046_v29 }
  0x56   : > { %809 = vmatpush3.bf16.msra.mxu0 %v808_v63 }
  0x57   : > { %811 = vmatprep.subr.bf16.mxu0 %v810_v2 }
  0x58   : > { %839 = vmatpush3.bf16.msra.mxu1 %v838_v9 }
  0x59   : > { %840 = vmatprep.subr.bf16.mxu1 %v1046_v29 }
  0x5a   : > { %813 = vmatpush3.bf16.msra.mxu0 %v812_v8 }
  0x5b   : > { %815 = vmatprep.subr.bf16.mxu0 %v814_v11 }
  0x5c   : > { %842 = vmatpush3.bf16.msra.mxu1 %v841_v18 }
  0x5d   : > { %843 = vmatprep.subr.bf16.mxu1 %v1046_v29 }
  0x5e   : > { %817 = vmatpush3.bf16.msra.mxu0 %v816_v17 }
  0x5f   : > { %819 = vmatprep.subr.bf16.mxu0 %v818_v19 }
  0x60   : > { %845 = vmatpush3.bf16.msra.mxu1 %v844_v25 }
  0x62   : > { %821 = vmatpush3.bf16.msra.mxu0 %v820_v22 }
 0x116   : > { %v329_v27 = vpop.f32.mrb[0].mxu1 }
 0x117   : > { %v694_v30 = vpack.c.bf16 %v329_v27, %v329_v27  ;;  %v753_v31 = vpop.f32.mrb[1].mxu1  ;;  %788 = vmatmul.mubr.f32.vlgmr.msra.gmra.mrb[4].mxu1 %v329_v27 }
 0x118   : > { %v288_v26 = vpop.f32.mrb[0].mxu0  ;;  %v332_v33 = vpop.f32.mrb[2].mxu1 }
 0x119   : > { %v290_v28 = vpop.f32.mrb[1].mxu0  ;;  %349 = vst [vmem:[%s207_s9 + $0x8] sm:$0xf] %v694_v30  ;;  %v754_v35 = vpop.f32.mrb[3].mxu1 }
 0x11a   : > { %v693_v29 = vpack.c.bf16 %v290_v28, %v288_v26  ;;  %v292_v32 = vpop.f32.mrb[2].mxu0  ;;  %462 = vmatprep.mubr.f32.mxu0 %v290_v28 }
 0x11b   : > { %v293_v34 = vpop.f32.mrb[3].mxu0  ;;  %463 = vmatmul.mubr.f32.vlgmr.msra.gmra.mrb[4].mxu0 %v288_v26 }
 0x11c   : > { %348 = vst [vmem:[%s207_s9] sm:$0xff] %v693_v29 }
 0x11d   : > { %952 = shalt.err (!%p949_p7)
}
 0x11e   : > { %s953_s29 = scalar_lea.hbm %s1189_s14, 192  ;;  %s957_s6 = scalar_lea.hbm %s1260_s3, 384 }
 0x11f   : > { %p954_p8 = scmp.ne.s32.totalorder %s1189_s14, %s953_s29  ;;  %p958_p1 = scmp.lt.u32.totalorder %s1189_s14, %s1260_s3 }
 0x120   : > { %p959_p0 = scmp.lt.u32.totalorder %s957_s6, %s953_s29  ;;  %p961_p6 = scmp.lt.u32.totalorder %s953_s29, %s1189_s14 }
 0x121   : > { %p955_p11 = pnand %p954_p8, %p1272_p9 }
 0x122   : > { %p960_p5 = por %p959_p0, %p958_p1 }
 0x123   : > { %p956_p13 = pneg %p955_p11 }
 0x124   : > { %p962_p10 = por %p961_p6, %p960_p5 }
 0x126   : > { %p963_p12 = pnand %p962_p10, %p956_p13 }
 0x128   : > { %966 = shalt.err (!%p963_p12)
}
 0x129   : > { %852 = dma.vmem_to_hbm [thread:$0]  (%p1272_p9), %s560_s11, 192, %s1189_s14, %s540_s20  }
 0x12a   : > { %s681_s10 = sshll.u32 %s1182_s7, 3  ;;  %s690_s12 = sshll.u32 %s1095_s19, 7 }
 0x12b   : > { %s214_s13 = scalar_lea.vmem [#allocation6], %s681_s10  ;;  %s1214_s28 = scalar_lea.hbm %s1261_s4, %s690_s12 }
 0x12c   : > { %s572_s22 = sshll.u32 %s214_s13, 4  ;;  %s545_s11 = scalar_lea.sflag [#allocation7], %s1182_s7  ;;  %s1216_s22 = int_to_ptr.vmem [resolvable:$true] %s572_s22 }
 0x12d   : > { %s967_s14 = scalar_lea.vmem %s1216_s22, 128  ;;  %s1048_s19 = smov [#allocation6]  }
 0x12e   : > { %p968_p2 = scmp.ne.s32.totalorder %s1216_s22, %s967_s14  ;;  %s971_s20 = sshll.u32 %s1048_s19, 4  ;;  %s972_s20 = int_to_ptr.vmem [resolvable:$false] %s971_s20 }
 0x12f   : > { %s973_s29 = scalar_lea.vmem %s972_s20, 256  ;;  %p974_p7 = scmp.lt.s32.totalorder %s1216_s22, %s972_s20 }
 0x130   : > { %p969_p3 = pnand %p968_p2, %p1272_p9  ;;  %p975_p8 = scmp.lt.s32.totalorder %s973_s29, %s967_s14 }
 0x132   : > { %p970_p4 = pneg %p969_p3  ;;  %p976_p11 = por %p975_p8, %p974_p7 }
 0x134   : > { %p977_p13 = pnand %p976_p11, %p970_p4 }
 0x1ea   : > { %v534_v36 = vpop.f32.mrb[4].mxu1 }
 0x1eb   : > { %v789_v37 = vpop.f32.mrb[5].mxu1 }
 0x1ee   : > { %v729_v38 = vpop.f32.mrb[4].mxu0 }
 0x1ef   : > { %v730_v39 = vpop.f32.mrb[5].mxu0 }
 0x1f0   : > { %v731_v40 = vadd.f32 %v730_v39, %v729_v38 }
 0x1f2   : > { %v535_v41 = vadd.f32 %v731_v40, %v534_v36 }
 0x1f4   : > { %538 = vst [vmem:[%s214_s13] sm:$0xff] %v535_v41 }
 0x1f5   : > { %980 = shalt.err (!%p977_p13)
}
 0x1f6   : > { %s981_s7 = scalar_lea.hbm %s1214_s28, 128  ;;  %s985_s6 = scalar_lea.hbm %s1261_s4, 256 }
 0x1f7   : > { %p982_p1 = scmp.ne.s32.totalorder %s1214_s28, %s981_s7  ;;  %p986_p6 = scmp.lt.u32.totalorder %s1214_s28, %s1261_s4 }
 0x1f8   : > { %p987_p10 = scmp.lt.u32.totalorder %s985_s6, %s981_s7  ;;  %p989_p2 = scmp.lt.u32.totalorder %s981_s7, %s1214_s28 }
 0x1f9   : > { %p983_p0 = pnand %p982_p1, %p1272_p9 }
 0x1fa   : > { %p988_p12 = por %p987_p10, %p986_p6 }
 0x1fb   : > { %p984_p5 = pneg %p983_p0 }
 0x1fc   : > { %p990_p3 = por %p989_p2, %p988_p12 }
 0x1fe   : > { %p991_p4 = pnand %p990_p3, %p984_p5 }
 0x200   : > { %994 = shalt.err (!%p991_p4)
}
 0x201   : > { %853 = dma.vmem_to_hbm [thread:$0]  (%p1272_p9), %s1216_s22, 128, %s1214_s28, %s545_s11  }
 0x202 PF: > { %p869_p7 = scmp.ge.s32.totalorder %s1037_s18, 2  ;;  %s584_s10 = sand.u32 1, %s1025_s15  }
 0x203   : > { %p1273_p8 = scmp.ne.s32.totalorder %s1266_s26, 0  ;;  %s585_s12 = scalar_lea.sflag [#allocation4], %s584_s10 }
 0x205   : > { %p861_p11 = pnand %p869_p7, %p1273_p8 }
 0x207   : > { %1016 = dma.done.wait (!%p861_p11), %s585_s12, 192  }
 0x208   : > { %1018 = vsyncadd (!%p861_p11), %s585_s12, 4294967104  ;;  %s594_s13 = scalar_lea.sflag [#allocation7], %s584_s10 }
 0x209   : > { %1020 = dma.done.wait (!%p861_p11), %s594_s13, 128  }
 0x20a   : > { %1022 = vsyncadd (!%p861_p11), %s594_s13, 4294967168  ;;  %p19_p9 = scmp.ge.s32.totalorder %s1099_s21, 4   ;;  %s1274_s15 = smov %s1029_s16 }
 0x20b   : > { %s1275_s16 = smov %s1033_s17  ;;  %s1276_s17 = smov %s1110_s24 }
 0x20c   : > { %s1277_s18 = smov %s1099_s21  ;;  %21 = sbr.rel (!%p19_p9) target bundleno = 6 (0x6), region = 89 }
 0x213   :  { %599 = vsyncpa [#allocation3], 1 }
 0x214   :  { %601 = vsyncpa [#allocation3 + $0x1], 1 }
 0x215   :  { %602 = vsyncpa [#allocation4], 1 }
 0x216   :  { %604 = vsyncpa [#allocation4 + $0x1], 1 }
 0x217   :  { %605 = vsyncpa [#allocation7], 1 }
 0x218   :  { %607 = vsyncpa [#allocation7 + $0x1], 1 }

</bundles_post_ra>
